<compile_context>
chip_gen: v7x
topology: tpu7x:2x2x1
jax: 0.10.0
libtpu: 0.0.40
codegen_flags: <defaults>
</compile_context>

<pallas_src>
import functools

import jax
import jax.numpy as jnp
from jax.experimental import pallas as pl
from jax.experimental.pallas import tpu as pltpu


# ----------------------------------------------------------------------------
# Kernel
# ----------------------------------------------------------------------------
def _mdn_b_kernel(x_ref, w_ref, b_ref, out_ref, *, n_dist):
    """One fused matmul + masked softmax / epsilon epilogue, one full-block store."""
    # Single wide MXU matmul for both heads (bf16 or f32 in, f32 accumulate).
    y = jnp.dot(x_ref[...], w_ref[...],
                preferred_element_type=jnp.float32) + b_ref[...]

    # Column mask: first n_dist columns are the pi logits, the rest are probs.
    col = jax.lax.broadcasted_iota(jnp.int32, y.shape, dimension=1)
    is_pi = col < n_dist

    # Row-wise softmax over the pi columns only (masked, full-width arithmetic).
    logits = jnp.where(is_pi, y, -jnp.inf)
    m = jnp.max(logits, axis=-1, keepdims=True)
    e = jnp.exp(logits - m)                 # exactly 0 in non-pi columns
    denom = jnp.sum(e, axis=-1, keepdims=True)
    pi = e / denom                          # exact divide: rows sum to 1 (log-safe)

    # probs columns get +epsilon.  Single lane-dense store of the whole slab.
    out_ref[...] = jnp.where(is_pi, pi, y + jnp.float32(1e-6))


# ----------------------------------------------------------------------------
# Generation-aware heuristics
# ----------------------------------------------------------------------------
@functools.lru_cache(maxsize=1)
def _device_info():
    """(vmem_capacity_bytes, tensorcores_per_chip) with safe fallbacks."""
    vmem = 128 * 1024 * 1024
    try:
        vmem = int(pltpu.get_tpu_info().vmem_capacity_bytes)
    except Exception:
        pass
    cores = 1
    try:
        kind = jax.devices()[0].device_kind.lower()
        if "v7" in kind:                    # v7x: 2 TensorCores per chip
            cores = 2
    except Exception:
        pass
    return vmem, cores


def _round_up(x, m):
    return ((x + m - 1) // m) * m


def _choose_batch_tile(B, in_dim, width, x_itemsize, w_itemsize,
                       vmem_capacity, num_cores, tb_cap=None):
    """Largest batch tile that keeps double-buffered tiles + resident (x2
    buffered) weights inside a generation-aware VMEM budget."""
    budget = vmem_capacity // 4                         # 32 MiB v5e/v6e, 16 MiB v7x
    resident = 2 * (in_dim * width * w_itemsize + width * 4)   # fused W + bias, x2 buffering
    per_row = 2 * (in_dim * x_itemsize + width * 4)            # 2x-buffered x tile + out tile
    tb_max = max(8, (budget - resident) // per_row)
    tb_max = min(tb_max, 8192)                          # step-overhead amortization cap
    if tb_cap is not None:
        tb_max = min(tb_max, tb_cap)
    # Megacore (v7x): make sure the 'parallel' grid axis has >= num_cores steps
    # when the batch is big enough to be worth splitting.
    if num_cores > 1 and B >= 16 * num_cores:
        tb_max = min(tb_max, _round_up(pl.cdiv(B, num_cores), 8))
    if B <= tb_max:
        return int(B)                                   # single full block
    return int(max(8, (tb_max // 8) * 8))               # multiple of 8; last block may be partial


# ----------------------------------------------------------------------------
# Forward
# ----------------------------------------------------------------------------
def fuse_mdn_b_params(pi_w, pi_b, probs_w, probs_b, *, cast_bf16=True):
    """One-time fusion of the two heads into a single wide matmul operand.
    Weights are pre-transposed to (in_dim, out_features)."""
    w = jnp.concatenate([pi_w, probs_w], axis=1)                     # (in_dim, W)
    b = jnp.concatenate([pi_b, probs_b], axis=1).astype(jnp.float32)  # (1, W)
    if cast_bf16:
        w = w.astype(jnp.bfloat16)
    return w, b


@functools.partial(jax.jit, static_argnames=("n_dist", "tb_cap"))
def mdn_b_forward_fused(x, w, b, *, n_dist, tb_cap=None):
    """Hot path.  x: (B, in_dim).  Returns the fused (B, W) slab in f32,
    columns [0, n_dist) = pi (softmaxed), [n_dist, W) = probs(+1e-6) flat."""
    B, in_dim = x.shape
    width = w.shape[1]

    # Feed the MXU its native dtype; the f32->bf16 cast fuses with the producer
    # of x when this is called from inside a larger jit.
    x = x.astype(w.dtype)

    vmem_capacity, num_cores = _device_info()
    x_isz = jnp.dtype(x.dtype).itemsize
    w_isz = jnp.dtype(w.dtype).itemsize

    tb = _choose_batch_tile(B, in_dim, width, x_isz, w_isz,
                            vmem_capacity, num_cores, tb_cap)
    grid = (pl.cdiv(B, tb),)

    # Generation-aware VMEM limit: resident weights (x2 buffering) + pipelined
    # tiles, with 2x headroom, clamped to [16 MiB, capacity/2].
    vmem_need = (2 * (in_dim * width * w_isz + width * 4)
                 + 2 * tb * (in_dim * x_isz + width * 4))
    vmem_limit = int(min(vmem_capacity // 2,
                         max(16 * 1024 * 1024, 2 * vmem_need)))

    cost = pl.CostEstimate(
        flops=2 * B * in_dim * width,
        transcendentals=B * width,
        bytes_accessed=(B * in_dim * x_isz + in_dim * width * w_isz
                        + width * 4 + B * width * 4),
    )

    return pl.pallas_call(
        functools.partial(_mdn_b_kernel, n_dist=n_dist),
        out_shape=jax.ShapeDtypeStruct((B, width), jnp.float32),
        grid=grid,
        in_specs=[
            pl.BlockSpec((tb, in_dim), lambda i: (i, 0)),      # x: batch-tiled
            pl.BlockSpec((in_dim, width), lambda i: (0, 0)),   # fused weight: resident
            pl.BlockSpec((1, width), lambda i: (0, 0)),        # fused bias: resident
        ],
        out_specs=pl.BlockSpec((tb, width), lambda i: (i, 0)),  # lane-dense slab
        compiler_params=pltpu.CompilerParams(
            dimension_semantics=("parallel",),
            vmem_limit_bytes=vmem_limit,
        ),
        cost_estimate=cost,
    )(x, w, b)


def mdn_b_forward(x, w, b, *, n_dist, out_dim, tb_cap=None):
    """Torch-interface wrapper: returns (pi (B, n_dist), probs (B, n_dist, out_dim)).
    Prefer mdn_b_forward_fused in a larger jit so the split fuses downstream."""
    out_flat = mdn_b_forward_fused(x, w, b, n_dist=n_dist, tb_cap=tb_cap)
    B = out_flat.shape[0]
    pi = out_flat[:, :n_dist]
    probs = out_flat[:, n_dist:].reshape(B, n_dist, out_dim)
    return pi, probs


# ----------------------------------------------------------------------------
# Reference + init + checks
# ----------------------------------------------------------------------------
def init_mdn_b_params(key, in_dim, out_dim, n_dist):
    """PyTorch-Linear-style init (uniform +-1/sqrt(in_dim)); weights pre-transposed
    to (in_dim, out_features)."""
    k1, k2, k3, k4 = jax.random.split(key, 4)
    bound = 1.0 / (in_dim ** 0.5)
    pi_w = jax.random.uniform(k1, (in_dim, n_dist), jnp.float32, -bound, bound)
    pi_b = jax.random.uniform(k2, (1, n_dist), jnp.float32, -bound, bound)
    probs_w = jax.random.uniform(k3, (in_dim, out_dim * n_dist), jnp.float32,
                                 -bound, bound)
    probs_b = jax.random.uniform(k4, (1, out_dim * n_dist), jnp.float32,
                                 -bound, bound)
    return pi_w, pi_b, probs_w, probs_b


def mdn_b_reference_f32(x, pi_w, pi_b, probs_w, probs_b, n_dist, out_dim):
    """Pure-JAX f32 reference matching the PyTorch forward exactly."""
    logits = x @ pi_w + pi_b
    pi = jax.nn.softmax(logits, axis=1)
    probs = x @ probs_w + probs_b + 1e-6
    return pi, probs.reshape(-1, n_dist, out_dim)


def mdn_b_reference_fused(x, w, b, n_dist, out_dim):
    """Reference that mirrors the kernel's numerics (same input dtypes)."""
    y = jnp.dot(x.astype(w.dtype), w, preferred_element_type=jnp.float32) + b
    pi = jax.nn.softmax(y[:, :n_dist], axis=1)
    probs = (y[:, n_dist:] + jnp.float32(1e-6)).reshape(-1, n_dist, out_dim)
    return pi, probs


def _check(B, in_dim, out_dim, n_dist, seed, *, cast_bf16=True, tb_cap=None):
    key = jax.random.PRNGKey(seed)
    kx, kp = jax.random.split(key)
    x = jax.random.normal(kx, (B, in_dim), dtype=jnp.float32)
    pi_w, pi_b, probs_w, probs_b = init_mdn_b_params(kp, in_dim, out_dim, n_dist)
    w, b = fuse_mdn_b_params(pi_w, pi_b, probs_w, probs_b, cast_bf16=cast_bf16)

    pi, probs = mdn_b_forward(x, w, b, n_dist=n_dist, out_dim=out_dim, tb_cap=tb_cap)
    jax.block_until_ready((pi, probs))

    assert pi.shape == (B, n_dist)
    assert probs.shape == (B, n_dist, out_dim)

    # Tight check against a reference with the kernel's own numerics.
    pi_k, probs_k = mdn_b_reference_fused(x, w, b, n_dist, out_dim)
    assert jnp.allclose(pi, pi_k, atol=1e-4, rtol=1e-4)
    assert jnp.allclose(probs, probs_k, atol=1e-4, rtol=1e-4)

    # Looser check against the exact-f32 torch-faithful reference.
    pi_r, probs_r = mdn_b_reference_f32(x, pi_w, pi_b, probs_w, probs_b,
                                        n_dist, out_dim)
    tol = 3e-2 if cast_bf16 else 1e-4
    assert jnp.allclose(pi, pi_r, atol=tol, rtol=tol)
    assert jnp.allclose(probs, probs_r, atol=tol, rtol=tol)

    # Exact-divide softmax -> rows sum to 1 to float precision.
    assert jnp.allclose(jnp.sum(pi, axis=1), 1.0, atol=1e-5)


if __name__ == "__main__":
    # Small shape consistent with the module (bf16 fast path).
    _check(B=2, in_dim=32, out_dim=4, n_dist=8, seed=0)
    # f32 strict-parity path at small shape.
    _check(B=2, in_dim=32, out_dim=4, n_dist=8, seed=0, cast_bf16=False)
    # Larger, non-divisible batch with a forced small tile to exercise the
    # multi-step grid + partial last block path on any generation.
    _check(B=2000, in_dim=32, out_dim=4, n_dist=8, seed=1, tb_cap=512)
    print("KERNEL_OK")
</pallas_src>

<mosaic_0001>
module attributes {stable_mosaic.version = 11 : i64} {
  func.func @_mdn_b_kernel(%arg0: i32, %arg1: memref<2x32xbf16, #tpu.memory_space<vmem>>, %arg2: memref<32x40xbf16, #tpu.memory_space<vmem>>, %arg3: memref<1x40xf32, #tpu.memory_space<vmem>>, %arg4: memref<2x40xf32, #tpu.memory_space<vmem>>) attributes {dimension_semantics = [#tpu.dimension_semantics<parallel>], iteration_bounds = array<i64: 1>, scalar_prefetch = 0 : i64, scratch_operands = 0 : i64, tpu.core_type = #tpu.core_type<tc>, window_params = [{transform_indices = @transform_0, window_bounds = array<i64: 2, 32>}, {pipeline_mode = #tpu.pipeline_mode<synchronous>, transform_indices = @transform_1, window_bounds = array<i64: 32, 40>}, {pipeline_mode = #tpu.pipeline_mode<synchronous>, transform_indices = @transform_2, window_bounds = array<i64: 1, 40>}, {transform_indices = @transform_3, window_bounds = array<i64: 2, 40>}]} {
    %c0 = arith.constant 0 : index
    %c0_0 = arith.constant 0 : index
    %0 = vector.load %arg1[%c0, %c0_0] : memref<2x32xbf16, #tpu.memory_space<vmem>>, vector<2x32xbf16>
    %c0_1 = arith.constant 0 : index
    %c0_2 = arith.constant 0 : index
    %1 = vector.load %arg2[%c0_1, %c0_2] : memref<32x40xbf16, #tpu.memory_space<vmem>>, vector<32x40xbf16>
    %cst = arith.constant dense<0.000000e+00> : vector<2x40xf32>
    %2 = tpu.matmul %0, %1, %cst {dimension_numbers = #tpu.dot_dimension_numbers<[1], [0], [0], [1], [0, 0, 1, 1], [], []>} : vector<2x32xbf16>, vector<32x40xbf16>, vector<2x40xf32> -> vector<2x40xf32>
    %c0_3 = arith.constant 0 : index
    %c0_4 = arith.constant 0 : index
    %3 = vector.load %arg3[%c0_3, %c0_4] : memref<1x40xf32, #tpu.memory_space<vmem>>, vector<1x40xf32>
    %4 = vector.broadcast %3 : vector<1x40xf32> to vector<2x40xf32>
    %5 = arith.addf %2, %4 : vector<2x40xf32>
    %6 = tpu.iota {dimensions = array<i32: 1>} : vector<2x40xi32>
    %c8_i32 = arith.constant 8 : i32
    %7 = vector.broadcast %c8_i32 : i32 to vector<2x40xi32>
    %8 = arith.cmpi slt, %6, %7 : vector<2x40xi32>
    %cst_5 = arith.constant 0xFF800000 : f32
    %9 = vector.broadcast %cst_5 : f32 to vector<2x40xf32>
    %10 = arith.select %8, %5, %9 : vector<2x40xi1>, vector<2x40xf32>
    %cst_6 = arith.constant dense<0xFF800000> : vector<2xf32>
    %11 = vector.multi_reduction <maximumf>, %10, %cst_6 [1] : vector<2x40xf32> to vector<2xf32>
    %12 = vector.shape_cast %11 : vector<2xf32> to vector<2x1xf32>
    %13 = vector.broadcast %12 : vector<2x1xf32> to vector<2x40xf32>
    %14 = arith.subf %10, %13 : vector<2x40xf32>
    %15 = math.exp %14 : vector<2x40xf32>
    %cst_7 = arith.constant dense<0.000000e+00> : vector<2xf32>
    %16 = vector.multi_reduction <add>, %15, %cst_7 [1] : vector<2x40xf32> to vector<2xf32>
    %17 = vector.shape_cast %16 : vector<2xf32> to vector<2x1xf32>
    %18 = vector.broadcast %17 : vector<2x1xf32> to vector<2x40xf32>
    %19 = arith.divf %15, %18 : vector<2x40xf32>
    %cst_8 = arith.constant 9.99999997E-7 : f32
    %20 = vector.broadcast %cst_8 : f32 to vector<2x40xf32>
    %21 = arith.addf %5, %20 : vector<2x40xf32>
    %22 = arith.select %8, %19, %21 : vector<2x40xi1>, vector<2x40xf32>
    %c0_9 = arith.constant 0 : index
    %c0_10 = arith.constant 0 : index
    %23 = vector.load %arg4[%c0_9, %c0_10] : memref<2x40xf32, #tpu.memory_space<vmem>>, vector<2x40xf32>
    tpu.vector_store %arg4[%c0_9, %c0_10], %22 {strides = array<i32>} : memref<2x40xf32, #tpu.memory_space<vmem>>, vector<2x40xf32>,
    return
  }
  func.func @transform_0(%arg0: i32) -> (i32, i32) {
    %c0_i32 = arith.constant 0 : i32
    %c0_i32_0 = arith.constant 0 : i32
    return %arg0, %c0_i32 : i32, i32
  }
  func.func @transform_1(%arg0: i32) -> (i32, i32) {
    %c0_i32 = arith.constant 0 : i32
    %c0_i32_0 = arith.constant 0 : i32
    %c0_i32_1 = arith.constant 0 : i32
    return %c0_i32, %c0_i32_0 : i32, i32
  }
  func.func @transform_2(%arg0: i32) -> (i32, i32) {
    %c0_i32 = arith.constant 0 : i32
    %c0_i32_0 = arith.constant 0 : i32
    %c0_i32_1 = arith.constant 0 : i32
    return %c0_i32, %c0_i32_0 : i32, i32
  }
  func.func @transform_3(%arg0: i32) -> (i32, i32) {
    %c0_i32 = arith.constant 0 : i32
    %c0_i32_0 = arith.constant 0 : i32
    return %arg0, %c0_i32 : i32, i32
  }
}

</mosaic_0001>

<bundles_post_ra>
// kernel: mdn_b_forward_fused.1
= control target key start
LH: loop header
LB: loop body
LE: loop exit
PB: predicated region body
PF: predicated region fallthrough
CT: control target
= control target key end

     0   :  { %8 = vsyncpa [#allocation3], 0  ;;  %s268_s0 = inlined_call_operand.vmem [shape: bf16[2,32], index: 0, kind: input, shape index: {}]   ;;  %s269_s1 = inlined_call_operand.hbm [shape: bf16[32,40], index: 1, kind: input, shape index: {}]   ;;  %s270_s2 = inlined_call_operand.vmem [shape: f32[1,40], index: 2, kind: input, shape index: {}]   ;;  %s271_s3 = inlined_call_operand.hbm [shape: f32[2,40], index: 3, kind: output, shape index: {}]  }
   0x1   :  { %9 = vsyncpa [#allocation4], 0  ;;  %s207_s12 = smov [#allocation2]   ;;  %s159_s16 = scalar_lea.hbm %s269_s1, 256 }
   0x2   :  { %s17_s13 = sshll.u32 %s207_s12, 4  ;;  %p160_p0 = scmp.ne.s32.totalorder %s269_s1, %s159_s16  ;;  %s18_s13 = int_to_ptr.vmem [resolvable:$true] %s17_s13 }
   0x3   :  { %p163_p1 = scmp.lt.u32.totalorder %s159_s16, %s269_s1 }
   0x5   :  { %p165_p2 = pnand %p163_p1, %p160_p0 }
   0x7   :  { %168 = shalt.err (!%p165_p2)
}
   0x8   :  { %s169_s21 = scalar_lea.vmem %s18_s13, 256  ;;  %p174_p4 = scmp.lt.s32.totalorder %s18_s13, %s18_s13 }
   0x9   :  { %p170_p3 = scmp.ne.s32.totalorder %s18_s13, %s169_s21  ;;  %p175_p5 = scmp.lt.s32.totalorder %s169_s21, %s169_s21 }
   0xb   :  { %p176_p6 = por %p175_p5, %p174_p4 }
   0xd   :  { %p177_p7 = pnand %p176_p6, %p170_p3 }
   0xf   :  { %180 = shalt.err (!%p177_p7)
}
  0x10   :  { %s208_s22 = smov 64   ;;  %s209_s23 = smov 4  }
  0x11   :  { %23 = dma.hbm_to_vmem [thread:$0]  %s269_s1, 256, %s18_s13, [#allocation3], %s208_s22, %s208_s22, %s209_s23  }
  0x12   :  { %203 = dma.done.wait [#allocation3], 256  }
  0x13   :  { %204 = vsyncadd [#allocation3], 4294967040  ;;  %v210_v0 = vmov 0.0   ;;  %vm211_vm0 = vmmov 0   ;;  %v153_v1 = vld [vmem:[#allocation2] sm:$0xff]   ;;  %v154_v2 = vld [vmem:[#allocation2 + $0x8] sm:$0xff]   ;;  %v98_v4 = vlaneseq }
  0x14   :  { %139 = vmatprep.subr.bf16.mxu0 %v210_v0  ;;  %143 = vmatprep.mubr.msk.bf16.mxu0 %vm211_vm0, %v210_v0  ;;  %v30_v3 = vld [vmem:[%s268_s0] sm:$0x1]  ;;  %vm54_vm1 = vcmask 261120   ;;  %vm102_vm3 = vcmask 320512   ;;  %s212_s0 = smov [#allocation5]  }
  0x15   :  { %140 = vmatpush3.bf16.msra.mxu0 %v153_v1  ;;  %v99_v5 = vand.u32 127, %v98_v4  ;;  %v132_v6 = vld [vmem:[%s270_s2] ss:$0 sm:$0xff]  ;;  %s123_s2 = sshll.u32 %s212_s0, 4  ;;  %s124_s2 = int_to_ptr.vmem [resolvable:$true] %s123_s2 }
  0x16   :  { %141 = vmatprep.subr.bf16.mxu0 %v210_v0  ;;  %s181_s29 = scalar_lea.vmem %s124_s2, 32  ;;  %p186_p9 = scmp.lt.s32.totalorder %s124_s2, %s124_s2 }
  0x17   :  { %vm100_vm2 = vcmp.lt.s32.totalorder %v99_v5, 8  ;;  %p182_p8 = scmp.ne.s32.totalorder %s124_s2, %s181_s29  ;;  %p187_p10 = scmp.lt.s32.totalorder %s181_s29, %s181_s29 }
  0x19   :  { %142 = vmatpush3.bf16.msra.mxu0 %v154_v2  ;;  %p188_p11 = por %p187_p10, %p186_p9 }
  0x1b   :  { %p189_p12 = pnand %p188_p11, %p182_p8 }
  0x1c   :  { %144 = vmatmul.mubr.msk.bf16.vlgmr.msra.gmra.mrb[0].mxu0 %vm54_vm1, %v30_v3 }
  0xef   :  { %v92_v7 = vpop.f32.mrb[0].mxu0 }
  0xf0   :  { %v93_v8 = vadd.f32 %v132_v6, %v92_v7  ;;  %v145_v9 = vpop.f32.mrb[1].mxu0 }
  0xf1   :  { %v95_v10 = vpop.f32.mrb[2].mxu0 }
  0xf2   :  { %v146_v11 = vpop.f32.mrb[3].mxu0  ;;  %v101_v12 = vsel %vm100_vm2, %v93_v8, -inf  ;;  %v114_v21 = vadd.f32 1e-06, %v93_v8 }
  0xf3   :  { %v103_v13 = vsel %vm102_vm3, %v101_v12, -inf }
  0xf4   :  { %104 = vmax.xlane.f32.xlu0 %v103_v13 }
 0x181   :  { %v105_v14 = vpop.xlane.xlu0 %104 }
 0x182   :  { %v106_v15 = vsub.f32 %v101_v12, %v105_v14 }
 0x184   :  { %v107_v16 = vmul.f32 1.442695, %v106_v15 }
 0x186   :  { %155 = vpow2.f32 %v107_v16 }
 0x190   :  { %v156_v17 = vpop.eup %155 }
 0x191   :  { %v109_v18 = vsel %vm102_vm3, %v156_v17, 0.0 }
 0x192   :  { %110 = vadd.xlane.f32.xlu0 %v109_v18 }
 0x21f   :  { %v111_v19 = vpop.xlane.xlu0 %110 }
 0x220   :  { %157 = vrcp.f32 %v111_v19 }
 0x22a   :  { %v158_v20 = vpop.eup %157 }
 0x22b   :  { %v113_v22 = vmul.f32 %v158_v20, %v156_v17 }
 0x22d   :  { %v115_v23 = vsel %vm100_vm2, %v113_v22, %v114_v21 }
 0x22e   :  { %116 = vst.msk [vmem:[#allocation5] sm:$0x3] %vm102_vm3, %v115_v23 }
 0x22f   :  { %192 = shalt.err (!%p189_p12)
}
 0x230   :  { %s193_s5 = scalar_lea.hbm %s271_s3, 32 }
 0x231   :  { %p194_p13 = scmp.ne.s32.totalorder %s271_s3, %s193_s5  ;;  %p197_p0 = scmp.lt.u32.totalorder %s193_s5, %s271_s3 }
 0x233   :  { %p199_p1 = pnand %p197_p0, %p194_p13 }
 0x235   :  { %202 = shalt.err (!%p199_p1)
}
 0x236   :  { %126 = dma.vmem_to_hbm [thread:$0]  %s124_s2, 32, %s271_s3, [#allocation4]  }
 0x237   :  { %205 = dma.done.wait [#allocation4], 32  }
 0x238   :  { %206 = vsyncadd [#allocation4], 4294967264 }
 0x239   :  { %130 = vsyncpa [#allocation3], 1 }
 0x23a   :  { %131 = vsyncpa [#allocation4], 1 }

</bundles_post_ra>
